<compile_context>
chip_gen: v6e
topology: v6e:2x2x1
jax: 0.10.0
libtpu: 0.0.40
codegen_flags: <defaults>
</compile_context>

<pallas_src>
import functools

import jax
import jax.numpy as jnp
from jax.experimental import pallas as pl
from jax.experimental.pallas import tpu as pltpu

LANE = 128


def _round_up(a, b):
    return ((a + b - 1) // b) * b


def _vmem_budgets():
    """Return (io_budget_bytes, vmem_limit_bytes), generation aware."""
    cap = None
    try:
        info = pltpu.get_tpu_info()
        cap = getattr(info, "vmem_capacity_bytes", None)
    except Exception:
        cap = None
    if cap is None:
        cap = 64 * 1024 * 1024                      # conservative: v7x per-TC VMEM
    if cap >= 128 * 1024 * 1024:                    # v5e / v6e
        return 56 * 1024 * 1024, 96 * 1024 * 1024
    return 24 * 1024 * 1024, 44 * 1024 * 1024       # v7x


# --------------------------------------------------------------------------
# Single-pass kernel: full reduction axis resident per channel tile.
# --------------------------------------------------------------------------
def _bn_single_pass_kernel(x_ref, gamma_ref, beta_ref, o_ref, *, eps, inv_n):
    # x_ref: (tc, N); gamma/beta: (tc, 1) f32.  All N lanes are valid (block
    # last dim == full array dim); extra channel rows of a partial boundary
    # block only produce garbage rows whose output writes are masked.
    xf = x_ref[...].astype(jnp.float32)
    mean = jnp.sum(xf, axis=1, keepdims=True) * inv_n            # (tc, 1)
    d = xf - mean
    var = jnp.sum(d * d, axis=1, keepdims=True) * inv_n          # centered variance
    inv_std = jax.lax.rsqrt(var + eps)
    scale = gamma_ref[...] * inv_std                             # (tc, 1)
    shift = beta_ref[...] - mean * scale                         # (tc, 1)
    o_ref[...] = (xf * scale + shift).astype(o_ref.dtype)


# --------------------------------------------------------------------------
# Two-pass kernels: stats accumulation, then a single-FMA normalize sweep.
# --------------------------------------------------------------------------
def _bn_stats_kernel(x_ref, sum_ref, ssq_ref, acc_s, acc_q, *, n_valid, tn, ragged):
    j = pl.program_id(1)
    nj = pl.num_programs(1)

    @pl.when(j == 0)
    def _():
        acc_s[...] = jnp.zeros_like(acc_s)
        acc_q[...] = jnp.zeros_like(acc_q)

    def accum(xf):
        # Elementwise accumulation into (tc, 128) lane-partials: no per-tile
        # cross-lane (XLU) reduce, just VALU adds over 128-wide lane slices.
        s = acc_s[...]
        q = acc_q[...]
        for k in range(tn // LANE):
            blk = xf[:, k * LANE:(k + 1) * LANE]
            s = s + blk
            q = q + blk * blk
        acc_s[...] = s
        acc_q[...] = q

    if ragged:
        @pl.when(j < nj - 1)
        def _():
            accum(x_ref[...].astype(jnp.float32))

        @pl.when(j == nj - 1)
        def _():
            xf = x_ref[...].astype(jnp.float32)
            col = jax.lax.broadcasted_iota(jnp.int32, xf.shape, 1) + j * tn
            accum(jnp.where(col < n_valid, xf, 0.0))
    else:
        accum(x_ref[...].astype(jnp.float32))

    @pl.when(j == nj - 1)
    def _():
        # Single cross-lane reduce per channel tile (done once, not per N tile).
        sum_ref[...] = jnp.sum(acc_s[...], axis=1, keepdims=True)
        ssq_ref[...] = jnp.sum(acc_q[...], axis=1, keepdims=True)


def _bn_apply_kernel(x_ref, scale_ref, shift_ref, o_ref):
    xf = x_ref[...].astype(jnp.float32)
    o_ref[...] = (xf * scale_ref[...] + shift_ref[...]).astype(o_ref.dtype)


# --------------------------------------------------------------------------
# Wrapper
# --------------------------------------------------------------------------
def batchnorm3d(x, gamma, beta, *, eps=1e-5, force_two_pass=False):
    """x: (1, C, T, H, W); gamma, beta: (C,). Returns (1, C, T, H, W)."""
    assert x.shape[0] == 1, "BatchNorm3D requires leading dim == 1"
    _, C, T, H, W = x.shape
    N = T * H * W
    dtype = x.dtype
    itemsize = jnp.dtype(dtype).itemsize
    sub = 8 if itemsize >= 4 else 32 // itemsize         # 8 f32 / 16 bf16 / 32 int8

    io_budget, vmem_limit = _vmem_budgets()

    x2 = x.reshape(C, N)                                  # free view: (C, N) lane-dense
    g = gamma.astype(jnp.float32).reshape(C, 1)
    b = beta.astype(jnp.float32).reshape(C, 1)

    Np = _round_up(N, LANE)                               # internal lane padding (accounting)
    # Realistic per-row VMEM cost with the whole reduction axis resident:
    # 2x double-buffered input + 2x double-buffered output, plus one f32 temp
    # row only when the input dtype is narrower than f32.
    bytes_per_row = Np * (4 * itemsize + (0 if itemsize >= 4 else 4))
    max_tc = io_budget // bytes_per_row
    single_pass = (max_tc >= sub) and not force_two_pass

    if single_pass:
        tc_budget = max(sub, (max_tc // sub) * sub)
        tc = _round_up(max(1, pl.cdiv(C, 8)), sub)        # aim for ~8 grid steps
        min_rows = _round_up(pl.cdiv(1 << 20, max(Np * itemsize, 1)), sub)  # >=1 MiB tiles
        half_c = _round_up(max(1, pl.cdiv(C, 2)), sub)    # but keep >=2 steps when C allows
        tc = max(tc, min(min_rows, half_c))
        tc = min(tc, tc_budget, _round_up(C, sub))
        tc = max(tc, sub)

        out = pl.pallas_call(
            functools.partial(_bn_single_pass_kernel,
                              eps=float(eps), inv_n=1.0 / float(N)),
            out_shape=jax.ShapeDtypeStruct((C, N), dtype),
            grid=(pl.cdiv(C, tc),),
            in_specs=[
                pl.BlockSpec((tc, N), lambda i: (i, 0)),
                pl.BlockSpec((tc, 1), lambda i: (i, 0)),
                pl.BlockSpec((tc, 1), lambda i: (i, 0)),
            ],
            out_specs=pl.BlockSpec((tc, N), lambda i: (i, 0)),
            compiler_params=pltpu.CompilerParams(
                dimension_semantics=("parallel",),
                vmem_limit_bytes=vmem_limit,
            ),
        )(x2, g, b)
        return out.reshape(1, C, T, H, W)

    # ---------------- Two-pass path (large T*H*W) ----------------
    tc2 = min(_round_up(C, sub), 128)
    target_elems = (2 << 20) // itemsize                  # ~2 MiB input blocks
    tn2 = _round_up(pl.cdiv(target_elems, tc2), LANE)
    tn2 = min(tn2, 8192, _round_up(N, LANE))              # cap unroll of the accum loop
    tn2 = max(tn2, LANE)
    grid = (pl.cdiv(C, tc2), pl.cdiv(N, tn2))
    ragged = (N % tn2) != 0

    # Pass 1: per-channel sum / sum-of-squares, lane-partial accumulation.
    sums, ssqs = pl.pallas_call(
        functools.partial(_bn_stats_kernel, n_valid=N, tn=tn2, ragged=ragged),
        out_shape=(jax.ShapeDtypeStruct((C, 1), jnp.float32),
                   jax.ShapeDtypeStruct((C, 1), jnp.float32)),
        grid=grid,
        in_specs=[pl.BlockSpec((tc2, tn2), lambda i, j: (i, j))],
        out_specs=(pl.BlockSpec((tc2, 1), lambda i, j: (i, 0)),
                   pl.BlockSpec((tc2, 1), lambda i, j: (i, 0))),
        scratch_shapes=[pltpu.VMEM((tc2, LANE), jnp.float32),
                        pltpu.VMEM((tc2, LANE), jnp.float32)],
        compiler_params=pltpu.CompilerParams(
            dimension_semantics=("parallel", "arbitrary"),
            vmem_limit_bytes=vmem_limit,
        ),
    )(x2)

    # Finalize per-channel scale / shift (tiny, plain JAX).
    mean = sums / float(N)
    var = jnp.maximum(ssqs / float(N) - mean * mean, 0.0)
    inv_std = jax.lax.rsqrt(var + eps)
    scale = g * inv_std
    shift = b - mean * scale

    # Pass 2: y = x * scale + shift (one FMA per element, fully parallel).
    out = pl.pallas_call(
        _bn_apply_kernel,
        out_shape=jax.ShapeDtypeStruct((C, N), dtype),
        grid=grid,
        in_specs=[
            pl.BlockSpec((tc2, tn2), lambda i, j: (i, j)),
            pl.BlockSpec((tc2, 1), lambda i, j: (i, 0)),
            pl.BlockSpec((tc2, 1), lambda i, j: (i, 0)),
        ],
        out_specs=pl.BlockSpec((tc2, tn2), lambda i, j: (i, j)),
        compiler_params=pltpu.CompilerParams(
            dimension_semantics=("parallel", "parallel"),
            vmem_limit_bytes=vmem_limit,
        ),
    )(x2, scale, shift)
    return out.reshape(1, C, T, H, W)


def _reference(x, gamma, beta, eps=1e-5):
    # Pure-JAX reference of training-mode BatchNorm2d applied as in the module.
    xf = x.astype(jnp.float32)
    mean = jnp.mean(xf, axis=(0, 2, 3, 4), keepdims=True)
    var = jnp.mean((xf - mean) ** 2, axis=(0, 2, 3, 4), keepdims=True)
    g = gamma.reshape(1, -1, 1, 1, 1)
    b = beta.reshape(1, -1, 1, 1, 1)
    return ((xf - mean) / jnp.sqrt(var + eps) * g + b).astype(x.dtype)


if __name__ == "__main__":
    key = jax.random.PRNGKey(0)
    ks = jax.random.split(key, 9)

    # Case 1: single-pass, C < sublane tile (partial channel block), grid = 1.
    C, T, H, W = 4, 8, 16, 16
    x = jax.random.normal(ks[0], (1, C, T, H, W), dtype=jnp.float32)
    gamma = 1.0 + 0.1 * jax.random.normal(ks[1], (C,), dtype=jnp.float32)
    beta = 0.1 * jax.random.normal(ks[2], (C,), dtype=jnp.float32)
    y = jax.block_until_ready(batchnorm3d(x, gamma, beta))
    assert y.shape == (1, C, T, H, W)
    assert jnp.allclose(y, _reference(x, gamma, beta), atol=1e-4, rtol=1e-4), "case1 mismatch"

    # Case 2: single-pass, C=10 (grid=2 with a partial last channel block) and
    # a reduction length that is NOT a multiple of 128 (no host padding anywhere).
    C, T, H, W = 10, 5, 13, 17
    x = jax.random.normal(ks[3], (1, C, T, H, W), dtype=jnp.float32)
    gamma = 1.0 + 0.1 * jax.random.normal(ks[4], (C,), dtype=jnp.float32)
    beta = 0.1 * jax.random.normal(ks[5], (C,), dtype=jnp.float32)
    y = jax.block_until_ready(batchnorm3d(x, gamma, beta))
    assert y.shape == (1, C, T, H, W)
    assert jnp.allclose(y, _reference(x, gamma, beta), atol=1e-4, rtol=1e-4), "case2 mismatch"

    # Case 3: forced two-pass, multi-tile N accumulation with a ragged last tile.
    C, T, H, W = 6, 8, 15, 70
    x = jax.random.normal(ks[6], (1, C, T, H, W), dtype=jnp.float32)
    gamma = 1.0 + 0.1 * jax.random.normal(ks[7], (C,), dtype=jnp.float32)
    beta = 0.1 * jax.random.normal(ks[8], (C,), dtype=jnp.float32)
    y = jax.block_until_ready(batchnorm3d(x, gamma, beta, force_two_pass=True))
    assert y.shape == (1, C, T, H, W)
    assert jnp.allclose(y, _reference(x, gamma, beta), atol=1e-4, rtol=1e-4), "case3 mismatch"

    print("KERNEL_OK")
</pallas_src>

<mosaic_0001>
module attributes {stable_mosaic.version = 11 : i64} {
  func.func @_bn_single_pass_kernel(%arg0: i32, %arg1: memref<8x2048xf32, #tpu.memory_space<vmem>>, %arg2: memref<8x1xf32, #tpu.memory_space<vmem>>, %arg3: memref<8x1xf32, #tpu.memory_space<vmem>>, %arg4: memref<8x2048xf32, #tpu.memory_space<vmem>>) attributes {dimension_semantics = [#tpu.dimension_semantics<parallel>], iteration_bounds = array<i64: 1>, scalar_prefetch = 0 : i64, scratch_operands = 0 : i64, tpu.core_type = #tpu.core_type<tc>, window_params = [{transform_indices = @transform_0, window_bounds = array<i64: 8, 2048>}, {transform_indices = @transform_1, window_bounds = array<i64: 8, 1>}, {transform_indices = @transform_2, window_bounds = array<i64: 8, 1>}, {transform_indices = @transform_3, window_bounds = array<i64: 8, 2048>}]} {
    %c0 = arith.constant 0 : index
    %c0_0 = arith.constant 0 : index
    %0 = vector.load %arg1[%c0, %c0_0] : memref<8x2048xf32, #tpu.memory_space<vmem>>, vector<8x2048xf32>
    %cst = arith.constant dense<0.000000e+00> : vector<8xf32>
    %1 = vector.multi_reduction <add>, %0, %cst [1] : vector<8x2048xf32> to vector<8xf32>
    %2 = vector.shape_cast %1 : vector<8xf32> to vector<8x1xf32>
    %cst_1 = arith.constant 4.8828125E-4 : f32
    %3 = vector.broadcast %cst_1 : f32 to vector<8x1xf32>
    %4 = arith.mulf %2, %3 : vector<8x1xf32>
    %5 = vector.broadcast %4 : vector<8x1xf32> to vector<8x2048xf32>
    %6 = arith.subf %0, %5 : vector<8x2048xf32>
    %7 = arith.mulf %6, %6 : vector<8x2048xf32>
    %cst_2 = arith.constant dense<0.000000e+00> : vector<8xf32>
    %8 = vector.multi_reduction <add>, %7, %cst_2 [1] : vector<8x2048xf32> to vector<8xf32>
    %9 = vector.shape_cast %8 : vector<8xf32> to vector<8x1xf32>
    %cst_3 = arith.constant 4.8828125E-4 : f32
    %10 = vector.broadcast %cst_3 : f32 to vector<8x1xf32>
    %11 = arith.mulf %9, %10 : vector<8x1xf32>
    %cst_4 = arith.constant 9.99999974E-6 : f32
    %12 = vector.broadcast %cst_4 : f32 to vector<8x1xf32>
    %13 = arith.addf %11, %12 : vector<8x1xf32>
    %14 = math.rsqrt %13 : vector<8x1xf32>
    %c0_5 = arith.constant 0 : index
    %c0_6 = arith.constant 0 : index
    %15 = vector.load %arg2[%c0_5, %c0_6] : memref<8x1xf32, #tpu.memory_space<vmem>>, vector<8x1xf32>
    %16 = arith.mulf %15, %14 : vector<8x1xf32>
    %c0_7 = arith.constant 0 : index
    %c0_8 = arith.constant 0 : index
    %17 = vector.load %arg3[%c0_7, %c0_8] : memref<8x1xf32, #tpu.memory_space<vmem>>, vector<8x1xf32>
    %18 = arith.mulf %4, %16 : vector<8x1xf32>
    %19 = arith.subf %17, %18 : vector<8x1xf32>
    %20 = vector.broadcast %16 : vector<8x1xf32> to vector<8x2048xf32>
    %21 = arith.mulf %0, %20 : vector<8x2048xf32>
    %22 = vector.broadcast %19 : vector<8x1xf32> to vector<8x2048xf32>
    %23 = arith.addf %21, %22 : vector<8x2048xf32>
    %c0_9 = arith.constant 0 : index
    %c0_10 = arith.constant 0 : index
    %24 = vector.load %arg4[%c0_9, %c0_10] : memref<8x2048xf32, #tpu.memory_space<vmem>>, vector<8x2048xf32>
    tpu.vector_store %arg4[%c0_9, %c0_10], %23 {strides = array<i32>} : memref<8x2048xf32, #tpu.memory_space<vmem>>, vector<8x2048xf32>,
    return
  }
  func.func @transform_0(%arg0: i32) -> (i32, i32) {
    %c0_i32 = arith.constant 0 : i32
    %c0_i32_0 = arith.constant 0 : i32
    return %arg0, %c0_i32 : i32, i32
  }
  func.func @transform_1(%arg0: i32) -> (i32, i32) {
    %c0_i32 = arith.constant 0 : i32
    %c0_i32_0 = arith.constant 0 : i32
    return %arg0, %c0_i32 : i32, i32
  }
  func.func @transform_2(%arg0: i32) -> (i32, i32) {
    %c0_i32 = arith.constant 0 : i32
    %c0_i32_0 = arith.constant 0 : i32
    return %arg0, %c0_i32 : i32, i32
  }
  func.func @transform_3(%arg0: i32) -> (i32, i32) {
    %c0_i32 = arith.constant 0 : i32
    %c0_i32_0 = arith.constant 0 : i32
    return %arg0, %c0_i32 : i32, i32
  }
}

</mosaic_0001>

<bundles_post_ra>
// kernel: tpu_custom_call.1
= control target key start
LH: loop header
LB: loop body
LE: loop exit
PB: predicated region body
PF: predicated region fallthrough
CT: control target
= control target key end

     0   :  { %8 = vsyncpa [#allocation3], 0  ;;  %s549_s0 = inlined_call_operand.hbm [shape: f32[4,2048], index: 0, kind: input, shape index: {}]   ;;  %s550_s1 = inlined_call_operand.vmem [shape: f32[4,1], index: 1, kind: input, shape index: {}]   ;;  %s551_s2 = inlined_call_operand.vmem [shape: f32[4,1], index: 2, kind: input, shape index: {}]   ;;  %s552_s3 = inlined_call_operand.hbm [shape: f32[4,2048], index: 3, kind: output, shape index: {}]  }
   0x1   :  { %9 = vsyncpa [#allocation4], 0 }
   0x2   :  { %14 = vsyncadd [#allocation3], 1024  ;;  %s393_s12 = smov [#allocation2]  }
   0x3   :  { %s15_s13 = sshll.u32 %s393_s12, 4  ;;  %s16_s13 = int_to_ptr.vmem [resolvable:$true] %s15_s13 }
   0x4   :  { %s357_s14 = scalar_lea.vmem %s16_s13, 1024  ;;  %s361_s15 = scalar_lea.vmem %s16_s13, 2048 }
   0x5   :  { %p358_p0 = scmp.ne.s32.totalorder %s16_s13, %s357_s14  ;;  %p362_p1 = scmp.lt.s32.totalorder %s16_s13, %s16_s13 }
   0x6   :  { %p363_p2 = scmp.lt.s32.totalorder %s361_s15, %s357_s14 }
   0x8   :  { %p364_p3 = por %p363_p2, %p362_p1 }
   0xa   :  { %p365_p4 = pnand %p364_p3, %p358_p0 }
   0xc   :  { %368 = shalt.err (!%p365_p4)
}
   0xd   :  { %s394_s16 = smov 1024   ;;  %s395_s17 = smov 64  }
   0xe   :  { %21 = dma.hbm_to_vmem [thread:$0]  %s549_s0, 1024, %s16_s13, [#allocation3], %s394_s16, %s394_s16, %s395_s17  }
   0xf   :  { %389 = dma.done.wait [#allocation3], 2048  }
  0x10   :  { %390 = vsyncadd [#allocation3], 4294965248  ;;  %v426_v0 = vld [vmem:[#allocation2] sm:$0xff]  ;;  %v428_v1 = vld [vmem:[#allocation2 + $0x8] sm:$0xff]  ;;  %v396_v47 = vmov 839922192   ;;  %v115_v49 = vlaneseq }
  0x11   :  { %v430_v2 = vld [vmem:[#allocation2 + $0x40] sm:$0xff]  ;;  %v432_v3 = vld [vmem:[#allocation2 + $0x48] sm:$0xff]  ;;  %v440_v7 = vld [vmem:[#allocation2 + $0x10] sm:$0xff]  ;;  %v113_v48 = vunpack.c.l.s4 %v396_v47  ;;  %v397_v50 = vmov 1985246804  }
  0x12   :  { %v61_v4 = vcombine.low %v426_v0, %v430_v2  ;;  %v62_v5 = vcombine.high %v426_v0, %v430_v2  ;;  %v63_v6 = vcombine.low %v428_v1, %v432_v3  ;;  %v442_v8 = vld [vmem:[#allocation2 + $0x50] sm:$0xff]  ;;  %v64_v9 = vcombine.high %v428_v1, %v432_v3  ;;  %v448_v13 = vld [vmem:[#allocation2 + $0x18] sm:$0xff]  ;;  %v456_v19 = vld [vmem:[#allocation2 + $0x20] sm:$0xff] }
  0x13   :  { %v65_v11 = vcombine.low %v440_v7, %v442_v8  ;;  %v450_v14 = vld [vmem:[#allocation2 + $0x58] sm:$0xff]  ;;  %v66_v15 = vcombine.high %v440_v7, %v442_v8  ;;  %v458_v20 = vld [vmem:[#allocation2 + $0x60] sm:$0xff]  ;;  %v464_v25 = vld [vmem:[#allocation2 + $0x28] sm:$0xff]  ;;  %v120_v51 = vunpack.c.l.s4 %v397_v50  ;;  %v114_v52 = vunpack.c.0.s8 %v113_v48 }
  0x14   :  { %v93_v10 = vadd.f32 %v62_v5, %v61_v4  ;;  %v67_v17 = vcombine.low %v448_v13, %v450_v14  ;;  %v68_v21 = vcombine.high %v448_v13, %v450_v14  ;;  %v69_v23 = vcombine.low %v456_v19, %v458_v20  ;;  %v466_v26 = vld [vmem:[#allocation2 + $0x68] sm:$0xff]  ;;  %v472_v31 = vld [vmem:[#allocation2 + $0x30] sm:$0xff]  ;;  %v480_v37 = vld [vmem:[#allocation2 + $0x38] sm:$0xff] }
  0x15   :  { %v70_v27 = vcombine.high %v456_v19, %v458_v20  ;;  %v71_v29 = vcombine.low %v464_v25, %v466_v26  ;;  %v474_v32 = vld [vmem:[#allocation2 + $0x70] sm:$0xff]  ;;  %v72_v33 = vcombine.high %v464_v25, %v466_v26  ;;  %v482_v38 = vld [vmem:[#allocation2 + $0x78] sm:$0xff]  ;;  %v116_v53 = vshrl.u32 %v115_v49, 7 }
  0x16   :  { %v94_v12 = vadd.f32 %v93_v10, %v63_v6  ;;  %v73_v35 = vcombine.low %v472_v31, %v474_v32  ;;  %v74_v39 = vcombine.high %v472_v31, %v474_v32  ;;  %v75_v41 = vcombine.low %v480_v37, %v482_v38 }
  0x17   :  { %v76_v43 = vcombine.high %v480_v37, %v482_v38  ;;  %v121_v54 = vunpack.c.0.s8 %v120_v51  ;;  %v490_v55 = vsub.s32 %v114_v52, %v116_v53 }
  0x18   :  { %v95_v16 = vadd.f32 %v94_v12, %v64_v9 }
  0x19   :  { %v492_v56 = vsub.s32 %v121_v54, %v116_v53 }
  0x1a   :  { %v96_v18 = vadd.f32 %v95_v16, %v65_v11 }
  0x1c   :  { %v97_v22 = vadd.f32 %v96_v18, %v66_v15 }
  0x1e   :  { %v98_v24 = vadd.f32 %v97_v22, %v67_v17 }
  0x20   :  { %v99_v28 = vadd.f32 %v98_v24, %v68_v21 }
  0x22   :  { %v100_v30 = vadd.f32 %v99_v28, %v69_v23 }
  0x24   :  { %v101_v34 = vadd.f32 %v100_v30, %v70_v27 }
  0x26   :  { %v102_v36 = vadd.f32 %v101_v34, %v71_v29 }
  0x28   :  { %v103_v40 = vadd.f32 %v102_v36, %v72_v33 }
  0x2a   :  { %v104_v42 = vadd.f32 %v103_v40, %v73_v35 }
  0x2c   :  { %v105_v44 = vadd.f32 %v104_v42, %v74_v39 }
  0x2e   :  { %v106_v45 = vadd.f32 %v105_v44, %v75_v41 }
  0x30   :  { %v107_v46 = vadd.f32 %v106_v45, %v76_v43 }
  0x32   :  { %108 = vadd.xlane.f32.xlu0 %v107_v46 }
  0xbb   :  { %v109_v57 = vpop.xlane.xlu0 %108 }
  0xbc   :  { %v494_v58 = vmul.f32 0.00048828125, %v109_v57 }
  0xbe   :  { %v118_v59 = vrot.slane %v494_v58, %v490_v55  ;;  %v125_v60 = vrot.slane %v494_v58, %v492_v56 }
  0xc0   :  { %v128_v61 = vsub.f32 %v426_v0, %v118_v59  ;;  %v136_v62 = vsub.f32 %v430_v2, %v125_v60  ;;  %v129_v63 = vsub.f32 %v428_v1, %v118_v59  ;;  %v137_v4 = vsub.f32 %v432_v3, %v125_v60 }
  0xc1   :  { %v130_v9 = vsub.f32 %v440_v7, %v118_v59  ;;  %v138_v10 = vsub.f32 %v442_v8, %v125_v60  ;;  %v131_v17 = vsub.f32 %v448_v13, %v118_v59  ;;  %v139_v18 = vsub.f32 %v450_v14, %v125_v60 }
  0xc2   :  { %v144_v5 = vmul.f32 %v128_v61, %v128_v61  ;;  %v152_v6 = vmul.f32 %v136_v62, %v136_v62  ;;  %v145_v11 = vmul.f32 %v129_v63, %v129_v63  ;;  %v153_v12 = vmul.f32 %v137_v4, %v137_v4 }
  0xc3   :  { %v146_v21 = vmul.f32 %v130_v9, %v130_v9  ;;  %v154_v22 = vmul.f32 %v138_v10, %v138_v10  ;;  %v132_v29 = vsub.f32 %v456_v19, %v118_v59  ;;  %v140_v30 = vsub.f32 %v458_v20, %v125_v60 }
  0xc4   :  { %v176_v15 = vcombine.low %v144_v5, %v152_v6  ;;  %v177_v16 = vcombine.high %v144_v5, %v152_v6  ;;  %v178_v23 = vcombine.low %v145_v11, %v153_v12  ;;  %v179_v27 = vcombine.high %v145_v11, %v153_v12 }
  0xc5   :  { %v147_v33 = vmul.f32 %v131_v17, %v131_v17  ;;  %v155_v34 = vmul.f32 %v139_v18, %v139_v18  ;;  %v180_v35 = vcombine.low %v146_v21, %v154_v22  ;;  %v181_v39 = vcombine.high %v146_v21, %v154_v22 }
  0xc6   :  { %v208_v24 = vadd.f32 %v177_v16, %v176_v15  ;;  %v133_v41 = vsub.f32 %v464_v25, %v118_v59  ;;  %v141_v42 = vsub.f32 %v466_v26, %v125_v60  ;;  %v148_v43 = vmul.f32 %v132_v29, %v132_v29 }
  0xc7   :  { %v156_v44 = vmul.f32 %v140_v30, %v140_v30  ;;  %v182_v45 = vcombine.low %v147_v33, %v155_v34  ;;  %v183_v47 = vcombine.high %v147_v33, %v155_v34  ;;  %v134_v49 = vsub.f32 %v472_v31, %v118_v59  ;;  %v228_v33 = vld [vmem:[%s550_s1] sm:$0xff] }
  0xc8   :  { %v209_v28 = vadd.f32 %v208_v24, %v178_v23  ;;  %v142_v50 = vsub.f32 %v474_v32, %v125_v60  ;;  %v149_v51 = vmul.f32 %v133_v41, %v133_v41  ;;  %v157_v52 = vmul.f32 %v141_v42, %v141_v42 }
  0xc9   :  { %v184_v53 = vcombine.low %v148_v43, %v156_v44  ;;  %v185_v57 = vcombine.high %v148_v43, %v156_v44  ;;  %v135_v62 = vsub.f32 %v480_v37, %v118_v59  ;;  %v143_v63 = vsub.f32 %v482_v38, %v125_v60 }
  0xca   :  { %v210_v36 = vadd.f32 %v209_v28, %v179_v27  ;;  %v150_v4 = vmul.f32 %v134_v49, %v134_v49  ;;  %v158_v5 = vmul.f32 %v142_v50, %v142_v50  ;;  %v186_v6 = vcombine.low %v149_v51, %v157_v52 }
  0xcb   :  { %v187_v10 = vcombine.high %v149_v51, %v157_v52  ;;  %v151_v12 = vmul.f32 %v135_v62, %v135_v62  ;;  %v159_v15 = vmul.f32 %v143_v63, %v143_v63  ;;  %v398_v59 = vmov 0  }
  0xcc   :  { %v211_v40 = vadd.f32 %v210_v36, %v180_v35  ;;  %v188_v16 = vcombine.low %v150_v4, %v158_v5  ;;  %v189_v18 = vcombine.high %v150_v4, %v158_v5  ;;  %345 = vset.pattern.permute.xlu1 %v398_v59  ;;  %346 = vset.pattern.permute.xlu0 %v398_v59  ;;  %v230_v36 = vld [vmem:[%s551_s2] sm:$0xff] }
  0xcd   :  { %v190_v22 = vcombine.low %v151_v12, %v159_v15  ;;  %v191_v24 = vcombine.high %v151_v12, %v159_v15 }
  0xce   :  { %v212_v46 = vadd.f32 %v211_v40, %v181_v39 }
  0xd0   :  { %v213_v48 = vadd.f32 %v212_v46, %v182_v45 }
  0xd2   :  { %v214_v54 = vadd.f32 %v213_v48, %v183_v47 }
  0xd4   :  { %v215_v61 = vadd.f32 %v214_v54, %v184_v53 }
  0xd6   :  { %v216_v9 = vadd.f32 %v215_v61, %v185_v57 }
  0xd8   :  { %v217_v11 = vadd.f32 %v216_v9, %v186_v6 }
  0xda   :  { %v218_v17 = vadd.f32 %v217_v11, %v187_v10 }
  0xdc   :  { %v219_v21 = vadd.f32 %v218_v17, %v188_v16 }
  0xde   :  { %v220_v23 = vadd.f32 %v219_v21, %v189_v18 }
  0xe0   :  { %v221_v27 = vadd.f32 %v220_v23, %v190_v22 }
  0xe2   :  { %v222_v28 = vadd.f32 %v221_v27, %v191_v24 }
  0xe4   :  { %223 = vadd.xlane.f32.xlu0 %v222_v28 }
 0x16d   :  { %v224_v60 = vpop.xlane.xlu0 %223 }
 0x16e   :  { %v225_v29 = vmul.f32 0.00048828125, %v224_v60 }
 0x170   :  { %v226_v30 = vadd.f32 1e-05, %v225_v29 }
 0x172   :  { %347 = vrsqrt.f32 %v226_v30 }
 0x17f   :  { %v348_v34 = vpop.eup %347 }
 0x180   :  { %v229_v35 = vmul.f32 %v348_v34, %v228_v33 }
 0x182   :  { %235 = vperm.xlu1 %345, %v229_v35   ;;  %v231_v39 = vmul.f32 %v229_v35, %v494_v58 }
 0x184   :  { %v232_v40 = vsub.f32 %v230_v36, %v231_v39 }
 0x186   :  { %271 = vperm.xlu1 %345, %v232_v40  }
 0x1fd   :  { %v236_v41 = vpop.permute.xlu1 %235 }
 0x1fe   :  { %v243_v42 = vrot.slane %v236_v41, %v490_v55  ;;  %v250_v43 = vrot.slane %v236_v41, %v492_v56 }
 0x200   :  { %v253_v44 = vmul.f32 %v243_v42, %v426_v0  ;;  %v254_v45 = vmul.f32 %v243_v42, %v428_v1  ;;  %v255_v47 = vmul.f32 %v243_v42, %v440_v7  ;;  %v256_v48 = vmul.f32 %v243_v42, %v448_v13 }
 0x201   :  { %v272_v46 = vpop.permute.xlu1 %271  ;;  %v257_v49 = vmul.f32 %v243_v42, %v456_v19  ;;  %v258_v58 = vmul.f32 %v243_v42, %v464_v25  ;;  %v259_v50 = vmul.f32 %v243_v42, %v472_v31  ;;  %v260_v51 = vmul.f32 %v243_v42, %v480_v37 }
 0x202   :  { %v261_v52 = vmul.f32 %v250_v43, %v430_v2  ;;  %v262_v53 = vmul.f32 %v250_v43, %v432_v3  ;;  %v263_v0 = vmul.f32 %v250_v43, %v442_v8  ;;  %v264_v1 = vmul.f32 %v250_v43, %v450_v14 }
 0x203   :  { %v279_v7 = vrot.slane %v272_v46, %v490_v55  ;;  %v286_v13 = vrot.slane %v272_v46, %v492_v56  ;;  %v265_v19 = vmul.f32 %v250_v43, %v458_v20  ;;  %v266_v25 = vmul.f32 %v250_v43, %v466_v26 }
 0x204   :  { %v267_v31 = vmul.f32 %v250_v43, %v474_v32  ;;  %v268_v37 = vmul.f32 %v250_v43, %v482_v38 }
 0x205   :  { %v289_v54 = vadd.f32 %v279_v7, %v253_v44  ;;  %v290_v2 = vadd.f32 %v279_v7, %v254_v45  ;;  %v291_v57 = vadd.f32 %v279_v7, %v255_v47  ;;  %v292_v3 = vadd.f32 %v279_v7, %v256_v48 }
 0x206   :  { %v293_v61 = vadd.f32 %v279_v7, %v257_v49  ;;  %v294_v8 = vadd.f32 %v279_v7, %v258_v58  ;;  %v295_v62 = vadd.f32 %v279_v7, %v259_v50  ;;  %v296_v14 = vadd.f32 %v279_v7, %v260_v51 }
 0x207   :  { %v297_v63 = vadd.f32 %v286_v13, %v261_v52  ;;  %v298_v55 = vadd.f32 %v286_v13, %v262_v53  ;;  %v299_v4 = vadd.f32 %v286_v13, %v263_v0  ;;  %v300_v56 = vadd.f32 %v286_v13, %v264_v1  ;;  %305 = vst [vmem:[#allocation5] sm:$0xff] %v289_v54 }
 0x208   :  { %306 = vst [vmem:[#allocation5 + $0x8] sm:$0xff] %v290_v2  ;;  %307 = vst [vmem:[#allocation5 + $0x10] sm:$0xff] %v291_v57  ;;  %v301_v20 = vadd.f32 %v286_v13, %v265_v19  ;;  %v302_v26 = vadd.f32 %v286_v13, %v266_v25  ;;  %v303_v32 = vadd.f32 %v286_v13, %v267_v31 }
 0x209   :  { %308 = vst [vmem:[#allocation5 + $0x18] sm:$0xff] %v292_v3  ;;  %v304_v38 = vadd.f32 %v286_v13, %v268_v37  ;;  %309 = vst [vmem:[#allocation5 + $0x20] sm:$0xff] %v293_v61 }
 0x20a   :  { %310 = vst [vmem:[#allocation5 + $0x28] sm:$0xff] %v294_v8  ;;  %311 = vst [vmem:[#allocation5 + $0x30] sm:$0xff] %v295_v62 }
 0x20b   :  { %312 = vst [vmem:[#allocation5 + $0x38] sm:$0xff] %v296_v14  ;;  %313 = vst [vmem:[#allocation5 + $0x40] sm:$0xff] %v297_v63 }
 0x20c   :  { %314 = vst [vmem:[#allocation5 + $0x48] sm:$0xff] %v298_v55  ;;  %315 = vst [vmem:[#allocation5 + $0x50] sm:$0xff] %v299_v4 }
 0x20d   :  { %316 = vst [vmem:[#allocation5 + $0x58] sm:$0xff] %v300_v56  ;;  %317 = vst [vmem:[#allocation5 + $0x60] sm:$0xff] %v301_v20 }
 0x20e   :  { %318 = vst [vmem:[#allocation5 + $0x68] sm:$0xff] %v302_v26  ;;  %319 = vst [vmem:[#allocation5 + $0x70] sm:$0xff] %v303_v32 }
 0x20f   :  { %320 = vst [vmem:[#allocation5 + $0x78] sm:$0xff] %v304_v38 }
 0x210   :  { %325 = vsyncadd [#allocation4], 1024  ;;  %s399_s1 = smov [#allocation5]  }
 0x211   :  { %s326_s2 = sshll.u32 %s399_s1, 4  ;;  %s327_s2 = int_to_ptr.vmem [resolvable:$true] %s326_s2 }
 0x212   :  { %s369_s23 = scalar_lea.vmem %s327_s2, 1024  ;;  %s373_s24 = scalar_lea.vmem %s327_s2, 2048 }
 0x213   :  { %p370_p5 = scmp.ne.s32.totalorder %s327_s2, %s369_s23  ;;  %p374_p6 = scmp.lt.s32.totalorder %s327_s2, %s327_s2 }
 0x214   :  { %p375_p7 = scmp.lt.s32.totalorder %s373_s24, %s369_s23 }
 0x216   :  { %p376_p8 = por %p375_p7, %p374_p6 }
 0x218   :  { %p377_p9 = pnand %p376_p8, %p370_p5 }
 0x21a   :  { %380 = shalt.err (!%p377_p9)
}
 0x21b   :  { %332 = dma.vmem_to_hbm [thread:$0]  %s327_s2, 1024, %s552_s3, [#allocation4], %s394_s16, %s394_s16, %s395_s17  }
 0x21c   :  { %391 = dma.done.wait [#allocation4], 2048  }
 0x21d   :  { %392 = vsyncadd [#allocation4], 4294965248 }
 0x21e   :  { %336 = vsyncpa [#allocation3], 1 }
 0x21f   :  { %337 = vsyncpa [#allocation4], 1 }

</bundles_post_ra>
